<compile_context>
chip_gen: v6e
topology: v6e:2x2x1
jax: 0.10.0
libtpu: 0.0.40
codegen_flags: <defaults>
</compile_context>

<pallas_src>
import jax
import jax.numpy as jnp
from jax.experimental import pallas as pl
from jax.experimental.pallas import tpu as pltpu


def _round_up(a, b):
    return ((a + b - 1) // b) * b


def _patch_proj_kernel(x_ref, w_ref, b_ref, o_ref):
    # x_ref: [tm, K_pad] bf16 patches, w_ref: [K_pad, tn] bf16 weight (VMEM
    # resident), b_ref: [1, tn] f32 bias, o_ref: [tm, tn] output.
    acc = jnp.dot(x_ref[...], w_ref[...], preferred_element_type=jnp.float32)
    o_ref[...] = (acc + b_ref[...]).astype(o_ref.dtype)


def patch_embed_pallas(x, weight, bias, patch_size, *,
                       out_dtype=jnp.bfloat16, channels_last=False):
    """x: [B, C, H, W]; weight: [embed_dim, C, p, p]; bias: [embed_dim].

    Returns [B, embed_dim, H/p, W/p] (NCHW, like PyTorch Conv2d with
    stride=kernel_size=patch_size, padding=0), or [B, H/p, W/p, embed_dim]
    when channels_last=True (skips the final HBM transpose pass).
    Matmul runs in bf16 with f32 accumulation; output dtype is `out_dtype`.
    """
    B, C, H, W = x.shape
    embed_dim = weight.shape[0]
    p = patch_size
    assert H % p == 0 and W % p == 0
    Hp, Wp = H // p, W // p

    M = B * Hp * Wp
    K = C * p * p
    N = embed_dim

    # --- im2col in bf16 (cheaper HBM intermediate than f32) -----------------
    # [B,C,Hp,p,Wp,p] -> [B,Hp,Wp,C,p,p] -> [M,K]
    x_bf = x.astype(jnp.bfloat16)
    patches = x_bf.reshape(B, C, Hp, p, Wp, p)
    patches = jnp.transpose(patches, (0, 2, 4, 1, 3, 5)).reshape(M, K)

    # Flatten weight to [K, N] matching (c, ky, kx) patch ordering.
    w_flat = weight.reshape(N, K).T.astype(jnp.bfloat16)
    b_row = bias.reshape(1, N).astype(jnp.float32)

    # --- tile sizes & padding ------------------------------------------------
    # K: single tile (PatchEmbed's K = C*p^2 is small), padded to 128 lanes.
    K_pad = _round_up(K, 128)

    # M: multiple of 16 always (bf16 sublane packing); 256-aligned large tiles
    # for big M so the 256x256 MXU on v6e/v7x is fully fed and the parallel
    # grid axis has >= 2 blocks for megacore sharding.
    if M > 2048:
        tm = 1024
    elif M > 1024:
        tm = 512
    else:
        tm = _round_up(M, 16)           # single M tile
    M_pad = _round_up(M, tm)

    # N: hold the whole (padded) embed_dim in one tile whenever reasonable so
    # the weight/bias blocks are fetched exactly once for the whole call.
    N_pad = _round_up(N, 128)
    if N_pad <= 2048:
        tn = N_pad
    else:                               # unrealistically huge embed_dim
        tn = 1024
        N_pad = _round_up(N, tn)

    if (M_pad, K_pad) != (M, K):
        patches = jnp.pad(patches, ((0, M_pad - M), (0, K_pad - K)))
    if (K_pad, N_pad) != (K, N):
        w_flat = jnp.pad(w_flat, ((0, K_pad - K), (0, N_pad - N)))
    if N_pad != N:
        b_row = jnp.pad(b_row, ((0, 0), (0, N_pad - N)))

    grid = (M_pad // tm, N_pad // tn)   # usually (Mt, 1); both parallel

    out_itemsize = jnp.dtype(out_dtype).itemsize

    # VMEM budget from the actual double-buffered working set (+2x headroom),
    # clamped so it is safe on v7x's 64 MiB physical VMEM.
    working = (2 * tm * K_pad * 2       # patches tiles (bf16, double-buffered)
               + 2 * K_pad * tn * 2     # resident weight (bf16)
               + 2 * tn * 4             # bias row (f32)
               + 2 * tm * tn * out_itemsize)
    vmem_limit = int(min(max(2 * working, 16 * 1024 * 1024), 64 * 1024 * 1024))

    cost = pl.CostEstimate(
        flops=2 * M_pad * K_pad * N_pad,
        bytes_accessed=(M_pad * K_pad * 2        # patches read once
                        + K_pad * N_pad * 2      # weight read once (resident)
                        + N_pad * 4              # bias
                        + M_pad * N_pad * out_itemsize),
        transcendentals=0,
    )

    out = pl.pallas_call(
        _patch_proj_kernel,
        out_shape=jax.ShapeDtypeStruct((M_pad, N_pad), out_dtype),
        grid_spec=pltpu.PrefetchScalarGridSpec(
            num_scalar_prefetch=0,
            grid=grid,
            in_specs=[
                pl.BlockSpec((tm, K_pad), lambda i, j: (i, 0)),
                pl.BlockSpec((K_pad, tn), lambda i, j: (0, j)),   # resident
                pl.BlockSpec((1, tn), lambda i, j: (0, j)),       # resident
            ],
            out_specs=pl.BlockSpec((tm, tn), lambda i, j: (i, j)),
        ),
        compiler_params=pltpu.CompilerParams(
            dimension_semantics=("parallel", "parallel"),
            vmem_limit_bytes=vmem_limit,
        ),
        cost_estimate=cost,
    )(patches, w_flat, b_row)

    out = out[:M, :N]

    # [M, N] -> [B, Hp, Wp, N]; optionally transpose to NCHW (Conv2d layout).
    out = out.reshape(B, Hp, Wp, N)
    if channels_last:
        return out
    return jnp.transpose(out, (0, 3, 1, 2))


if __name__ == "__main__":
    # Small shapes consistent with the module: B=2, in_chans=4, H=W=16,
    # patch_size=4, embed_dim=32.
    B, C, H, W = 2, 4, 16, 16
    patch_size = 4
    embed_dim = 32

    key = jax.random.PRNGKey(0)
    kx, kw, kb = jax.random.split(key, 3)
    x = jax.random.normal(kx, (B, C, H, W), dtype=jnp.float32)
    # Deterministic synthetic parameters (Conv2d weight/bias shapes).
    weight = jax.random.normal(kw, (embed_dim, C, patch_size, patch_size),
                               dtype=jnp.float32) * 0.05
    bias = jax.random.normal(kb, (embed_dim,), dtype=jnp.float32) * 0.01

    out = patch_embed_pallas(x, weight, bias, patch_size)
    out = jax.block_until_ready(out)

    # Cross-check against XLA's conv (same semantics as PyTorch Conv2d, pad=0).
    ref = jax.lax.conv_general_dilated(
        x, weight, window_strides=(patch_size, patch_size), padding="VALID",
        dimension_numbers=("NCHW", "OIHW", "NCHW"),
    ) + bias.reshape(1, embed_dim, 1, 1)
    assert out.shape == (B, embed_dim, H // patch_size, W // patch_size)
    assert out.dtype == jnp.bfloat16
    # bf16 matmul inputs + bf16 output with f32 accumulation -> loose tol.
    assert jnp.allclose(out.astype(jnp.float32), ref, atol=3e-2, rtol=3e-2)

    print("KERNEL_OK")
</pallas_src>

<mosaic_0001>
module attributes {stable_mosaic.version = 11 : i64} {
  func.func @_patch_proj_kernel(%arg0: i32, %arg1: i32, %arg2: memref<32x128xbf16, #tpu.memory_space<vmem>>, %arg3: memref<128x128xbf16, #tpu.memory_space<vmem>>, %arg4: memref<1x128xf32, #tpu.memory_space<vmem>>, %arg5: memref<32x128xbf16, #tpu.memory_space<vmem>>) attributes {dimension_semantics = [#tpu.dimension_semantics<parallel>, #tpu.dimension_semantics<parallel>], iteration_bounds = array<i64: 1, 1>, scalar_prefetch = 0 : i64, scratch_operands = 0 : i64, tpu.core_type = #tpu.core_type<tc>, window_params = [{transform_indices = @transform_0, window_bounds = array<i64: 32, 128>}, {transform_indices = @transform_1, window_bounds = array<i64: 128, 128>}, {transform_indices = @transform_2, window_bounds = array<i64: 1, 128>}, {transform_indices = @transform_3, window_bounds = array<i64: 32, 128>}]} {
    %c0 = arith.constant 0 : index
    %c0_0 = arith.constant 0 : index
    %0 = vector.load %arg2[%c0, %c0_0] : memref<32x128xbf16, #tpu.memory_space<vmem>>, vector<32x128xbf16>
    %c0_1 = arith.constant 0 : index
    %c0_2 = arith.constant 0 : index
    %1 = vector.load %arg3[%c0_1, %c0_2] : memref<128x128xbf16, #tpu.memory_space<vmem>>, vector<128x128xbf16>
    %cst = arith.constant dense<0.000000e+00> : vector<32x128xf32>
    %2 = tpu.matmul %0, %1, %cst {dimension_numbers = #tpu.dot_dimension_numbers<[1], [0], [0], [1], [0, 0, 1, 1], [], []>} : vector<32x128xbf16>, vector<128x128xbf16>, vector<32x128xf32> -> vector<32x128xf32>
    %c0_3 = arith.constant 0 : index
    %c0_4 = arith.constant 0 : index
    %3 = vector.load %arg4[%c0_3, %c0_4] : memref<1x128xf32, #tpu.memory_space<vmem>>, vector<1x128xf32>
    %4 = vector.broadcast %3 : vector<1x128xf32> to vector<32x128xf32>
    %5 = arith.addf %2, %4 : vector<32x128xf32>
    %6 = arith.truncf %5 : vector<32x128xf32> to vector<32x128xbf16>
    %c0_5 = arith.constant 0 : index
    %c0_6 = arith.constant 0 : index
    %7 = vector.load %arg5[%c0_5, %c0_6] : memref<32x128xbf16, #tpu.memory_space<vmem>>, vector<32x128xbf16>
    tpu.vector_store %arg5[%c0_5, %c0_6], %6 {strides = array<i32>} : memref<32x128xbf16, #tpu.memory_space<vmem>>, vector<32x128xbf16>,
    return
  }
  func.func @transform_0(%arg0: i32, %arg1: i32) -> (i32, i32) {
    %c0_i32 = arith.constant 0 : i32
    %c0_i32_0 = arith.constant 0 : i32
    return %arg0, %c0_i32 : i32, i32
  }
  func.func @transform_1(%arg0: i32, %arg1: i32) -> (i32, i32) {
    %c0_i32 = arith.constant 0 : i32
    %c0_i32_0 = arith.constant 0 : i32
    return %c0_i32, %arg1 : i32, i32
  }
  func.func @transform_2(%arg0: i32, %arg1: i32) -> (i32, i32) {
    %c0_i32 = arith.constant 0 : i32
    %c0_i32_0 = arith.constant 0 : i32
    return %c0_i32, %arg1 : i32, i32
  }
  func.func @transform_3(%arg0: i32, %arg1: i32) -> (i32, i32) {
    %c0_i32 = arith.constant 0 : i32
    return %arg0, %arg1 : i32, i32
  }
}

</mosaic_0001>

<bundles_post_ra>
// kernel: tpu_custom_call.1
= control target key start
LH: loop header
LB: loop body
LE: loop exit
PB: predicated region body
PF: predicated region fallthrough
CT: control target
= control target key end

     0   :  { %8 = vsyncpa [#allocation3], 0  ;;  %s405_s0 = inlined_call_operand.hbm [shape: bf16[32,128], index: 0, kind: input, shape index: {}]   ;;  %s406_s1 = inlined_call_operand.hbm [shape: bf16[128,128], index: 1, kind: input, shape index: {}]   ;;  %s407_s2 = inlined_call_operand.vmem [shape: f32[1,128], index: 2, kind: input, shape index: {}]   ;;  %s408_s3 = inlined_call_operand.hbm [shape: bf16[32,128], index: 3, kind: output, shape index: {}]  }
   0x1   :  { %9 = vsyncpa [#allocation6], 0 }
   0x2   :  { %10 = vsyncpa [#allocation4], 0  ;;  %s359_s12 = smov [#allocation2]  }
   0x3   :  { %s16_s13 = sshll.u32 %s359_s12, 4  ;;  %s17_s13 = int_to_ptr.vmem [resolvable:$true] %s16_s13 }
   0x4   :  { %s301_s14 = scalar_lea.vmem %s17_s13, 256  ;;  %p306_p1 = scmp.lt.s32.totalorder %s17_s13, %s17_s13 }
   0x5   :  { %p302_p0 = scmp.ne.s32.totalorder %s17_s13, %s301_s14  ;;  %p307_p2 = scmp.lt.s32.totalorder %s301_s14, %s301_s14 }
   0x7   :  { %p308_p3 = por %p307_p2, %p306_p1 }
   0x9   :  { %p309_p4 = pnand %p308_p3, %p302_p0 }
   0xb   :  { %312 = shalt.err (!%p309_p4)
}
   0xc   :  { %s360_s15 = smov 64   ;;  %s361_s16 = smov 4  }
   0xd   :  { %22 = dma.hbm_to_vmem [thread:$0]  %s405_s0, 256, %s17_s13, [#allocation3], %s360_s15, %s360_s15, %s361_s16  }
   0xe   :  { %s362_s19 = smov [#allocation5]  }
   0xf   :  { %s28_s20 = sshll.u32 %s362_s19, 4  ;;  %s29_s20 = int_to_ptr.vmem [resolvable:$true] %s28_s20 }
  0x10   :  { %s321_s21 = scalar_lea.vmem %s29_s20, 1024  ;;  %p326_p6 = scmp.lt.s32.totalorder %s29_s20, %s29_s20 }
  0x11   :  { %p322_p5 = scmp.ne.s32.totalorder %s29_s20, %s321_s21  ;;  %p327_p7 = scmp.lt.s32.totalorder %s321_s21, %s321_s21 }
  0x13   :  { %p328_p8 = por %p327_p7, %p326_p6 }
  0x15   :  { %p329_p9 = pnand %p328_p8, %p322_p5 }
  0x17   :  { %332 = shalt.err (!%p329_p9)
}
  0x18   :  { %34 = dma.hbm_to_vmem [thread:$0]  %s406_s1, 1024, %s29_s20, [#allocation6], %s360_s15, %s360_s15, %s361_s16  }
  0x19   :  { %353 = dma.done.wait [#allocation3], 256  }
  0x1a   :  { %354 = vsyncadd [#allocation3], 4294967040 }
  0x1b   :  { %355 = dma.done.wait [#allocation6], 1024  }
  0x1c   :  { %356 = vsyncadd [#allocation6], 4294966272  ;;  %v283_v0 = vld [vmem:[#allocation5 + $0x38] sm:$0xff]   ;;  %v284_v1 = vld [vmem:[#allocation5 + $0x30] sm:$0xff]   ;;  %s363_s24 = smov [#allocation7]  }
  0x1d   :  { %258 = vmatprep.subr.bf16.mxu0 %v283_v0  ;;  %v285_v2 = vld [vmem:[#allocation5 + $0x28] sm:$0xff]   ;;  %v286_v3 = vld [vmem:[#allocation5 + $0x20] sm:$0xff]   ;;  %v291_v4 = vld [vmem:[#allocation2] sm:$0xff]   ;;  %s205_s25 = sshll.u32 %s363_s24, 4  ;;  %s206_s25 = int_to_ptr.vmem [resolvable:$true] %s205_s25 }
  0x1e   :  { %259 = vmatpush3.bf16.msra.mxu0 %v283_v0  ;;  %274 = vmatprep.mubr.bf16.mxu0 %v291_v4  ;;  %v287_v5 = vld [vmem:[#allocation5 + $0x18] sm:$0xff]   ;;  %v288_v6 = vld [vmem:[#allocation5 + $0x10] sm:$0xff]   ;;  %v289_v7 = vld [vmem:[#allocation5 + $0x8] sm:$0xff]   ;;  %s333_s26 = scalar_lea.vmem %s206_s25, 256  ;;  %p338_p11 = scmp.lt.s32.totalorder %s206_s25, %s206_s25 }
  0x1f   :  { %260 = vmatprep.subr.bf16.mxu0 %v284_v1  ;;  %v290_v8 = vld [vmem:[#allocation5] sm:$0xff]   ;;  %v292_v9 = vld [vmem:[#allocation2 + $0x8] sm:$0xff]   ;;  %v218_v11 = vld [vmem:[%s407_s2] ss:$0 sm:$0xff]  ;;  %p334_p10 = scmp.ne.s32.totalorder %s206_s25, %s333_s26  ;;  %p339_p12 = scmp.lt.s32.totalorder %s333_s26, %s333_s26 }
  0x21   :  { %p340_p13 = por %p339_p12, %p338_p11 }
  0x22   :  { %261 = vmatpush3.bf16.msra.mxu0 %v284_v1 }
  0x23   :  { %262 = vmatprep.subr.bf16.mxu0 %v285_v2  ;;  %p341_p0 = pnand %p340_p13, %p334_p10 }
  0x26   :  { %263 = vmatpush3.bf16.msra.mxu0 %v285_v2 }
  0x27   :  { %264 = vmatprep.subr.bf16.mxu0 %v286_v3 }
  0x2a   :  { %265 = vmatpush3.bf16.msra.mxu0 %v286_v3 }
  0x2b   :  { %266 = vmatprep.subr.bf16.mxu0 %v287_v5 }
  0x2e   :  { %267 = vmatpush3.bf16.msra.mxu0 %v287_v5 }
  0x2f   :  { %268 = vmatprep.subr.bf16.mxu0 %v288_v6 }
  0x32   :  { %269 = vmatpush3.bf16.msra.mxu0 %v288_v6 }
  0x33   :  { %270 = vmatprep.subr.bf16.mxu0 %v289_v7 }
  0x36   :  { %271 = vmatpush3.bf16.msra.mxu0 %v289_v7 }
  0x37   :  { %272 = vmatprep.subr.bf16.mxu0 %v290_v8 }
  0x3a   :  { %273 = vmatpush3.bf16.msra.mxu0 %v290_v8 }
  0x3d   :  { %275 = vmatmul.mubr.bf16.vlgmr.msra.gmra.mxu0 %v292_v9 }
  0xfd   :  { %v276_v10 = vpop.f32.mrf.mxu0 }
  0xfe   :  { %v174_v14 = vadd.f32 %v276_v10, %v218_v11 }
  0xff   :  { %v165_v12 = vpop.f32.mrf.mxu0 }
 0x100   :  { %v166_v17 = vadd.f32 %v218_v11, %v165_v12 }
 0x101   :  { %v277_v13 = vpop.f32.mrf.mxu0 }
 0x102   :  { %v177_v15 = vadd.f32 %v277_v13, %v218_v11 }
 0x103   :  { %v168_v16 = vpop.f32.mrf.mxu0 }
 0x104   :  { %v245_v18 = vpack.c.bf16 %v177_v15, %v174_v14  ;;  %v169_v19 = vadd.f32 %v218_v11, %v168_v16 }
 0x106   :  { %247 = vst [vmem:[#allocation7 + $0x8] sm:$0xff] %v245_v18   ;;  %v240_v20 = vpack.c.bf16 %v169_v19, %v166_v17 }
 0x108   :  { %241 = vst [vmem:[#allocation7] sm:$0xff] %v240_v20  }
 0x109   :  { %344 = shalt.err (!%p341_p0)
}
 0x10a   :  { %211 = dma.vmem_to_hbm [thread:$0]  %s206_s25, 256, %s408_s3, [#allocation4], %s360_s15, %s360_s15, %s361_s16  }
 0x10b   :  { %357 = dma.done.wait [#allocation4], 256  }
 0x10c   :  { %358 = vsyncadd [#allocation4], 4294967040 }
 0x10d   :  { %215 = vsyncpa [#allocation3], 1 }
 0x10e   :  { %216 = vsyncpa [#allocation6], 1 }
 0x10f   :  { %217 = vsyncpa [#allocation4], 1 }

</bundles_post_ra>
